<compile_context>
chip_gen: v6e
topology: v6e:2x2x1
jax: 0.10.0
libtpu: 0.0.40
codegen_flags: <defaults>
</compile_context>

<pallas_src>
import functools

import jax
import jax.numpy as jnp
from jax.experimental import pallas as pl
from jax.experimental.pallas import tpu as pltpu

# ---- module constants (from FlatSpn2D.__init__) -------------------------------------
MIN_SCALE = 0.05
MAX_SCALE = 0.5
MIN_LOC = -3.0
MAX_LOC = 3.0
_LOG_2PI = 1.8378770664093453  # log(2*pi)


def _log_prob_kernel(data_ref, params_ref, out_ref):
    """One grid step: a (2, TILE) slab of samples vs. all K components.

    params_ref is (K, 8) with columns [loc0, loc1, a0, a1, bias, 0, 0, 0], where
    a = 0.5 / scale^2 and bias = log_softmax(w) - log(s0) - log(s1) - log(2*pi).
    """
    x = data_ref[...]            # (2, TILE)
    p = params_ref[...]          # (K, 8)

    x0 = x[0:1, :]               # (1, TILE)
    x1 = x[1:2, :]               # (1, TILE)

    loc0 = p[:, 0:1]             # (K, 1)
    loc1 = p[:, 1:2]
    a0 = p[:, 2:3]               # 0.5 / scale0^2  (folded 0.5 + inverse variance)
    a1 = p[:, 3:4]               # 0.5 / scale1^2
    bias = p[:, 4:5]

    # Pure VPU quadratic: broadcasts of the (1,TILE) rows across K sublanes and the
    # (K,1) params across lanes fuse into the vsub/vmul ops.
    d0 = x0 - loc0                                   # (K, TILE)
    d1 = x1 - loc1                                   # (K, TILE)
    logits = bias - a0 * (d0 * d0) - a1 * (d1 * d1)  # (K, TILE)

    # logsumexp over components (sublane axis): XLU reduces + EUP exp.
    m = jnp.max(logits, axis=0, keepdims=True)                     # (1, TILE)
    s = jnp.sum(jnp.exp(logits - m), axis=0, keepdims=True)        # (1, TILE)
    out_ref[...] = m + jnp.log(s)                                  # (1, TILE)


def _tpu_defaults():
    """(default lane tile, vmem limit) per TPU generation (safe fallback otherwise)."""
    tile_n, vmem = 65536, 48 * 1024 * 1024          # v7x: 64 MiB physical VMEM, 2 TCs
    try:
        kind = jax.devices()[0].device_kind.lower()
    except Exception:
        return tile_n, vmem
    if "v7" not in kind:                            # v5e / v6e: 128 MiB VMEM -> go bigger
        tile_n, vmem = 131072, 64 * 1024 * 1024
    return tile_n, vmem


@functools.partial(jax.jit, static_argnames=("tile_n",))
def flat_spn2d_log_prob_planar(data_t, loc_param, scale_param, weights, *, tile_n=None):
    """Planar fast path. data_t: (2, N) f32; loc_param/scale_param: (2, K); weights: (K,).

    Zero extra HBM plumbing: no pad, no output slice; returns (N,) f32 log-probs.
    """
    two, n = data_t.shape
    assert two == 2
    k = weights.shape[0]

    # ---- hoisted parameter math (tiny (K,)-sized XLA ops, once per call) ------------
    loc = jax.nn.sigmoid(loc_param.astype(jnp.float32)) * (MAX_LOC - MIN_LOC) + MIN_LOC
    scale = (jax.nn.sigmoid(scale_param.astype(jnp.float32))
             * (MAX_SCALE - MIN_SCALE) + MIN_SCALE)                            # (2, K)
    a = 0.5 / (scale * scale)                                                  # (2, K)
    logw = jax.nn.log_softmax(weights.astype(jnp.float32))                     # (K,)
    bias = logw - jnp.log(scale[0]) - jnp.log(scale[1]) - _LOG_2PI             # (K,)
    zeros = jnp.zeros_like(bias)
    params = jnp.stack(
        [loc[0], loc[1], a[0], a[1], bias, zeros, zeros, zeros], axis=1
    ).astype(jnp.float32)                                                      # (K, 8)

    # ---- lane-tile sizing ------------------------------------------------------------
    default_tile, vmem_limit = _tpu_defaults()
    if tile_n is None:
        tile_n = default_tile
    tile = max(128, (tile_n // 128) * 128)           # lane tile must be a multiple of 128
    n_ceil = ((n + 127) // 128) * 128
    tile = min(tile, n_ceil)                         # don't over-tile tiny inputs
    if n_ceil >= 256:                                # keep >= 2 grid steps (v7x megacore)
        half = ((pl.cdiv(n, 2) + 127) // 128) * 128
        tile = min(tile, max(128, half))

    grid = (pl.cdiv(n, tile),)                       # ragged edge: Pallas masks the tail

    out = pl.pallas_call(
        _log_prob_kernel,
        out_shape=jax.ShapeDtypeStruct((1, n), jnp.float32),
        grid_spec=pltpu.PrefetchScalarGridSpec(
            num_scalar_prefetch=0,
            grid=grid,
            in_specs=[
                pl.BlockSpec((2, tile), lambda i: (0, i)),   # sample slab (samples on lanes)
                pl.BlockSpec((k, 8), lambda i: (0, 0)),      # folded params, resident
            ],
            out_specs=pl.BlockSpec((1, tile), lambda i: (0, i)),  # lane-dense output row
        ),
        compiler_params=pltpu.CompilerParams(
            dimension_semantics=("parallel",),
            vmem_limit_bytes=vmem_limit),
    )(data_t.astype(jnp.float32), params)
    return out.reshape(n)                             # squeeze of leading 1-dim: free


@functools.partial(jax.jit, static_argnames=("tile_n",))
def flat_spn2d_log_prob(data, loc_param, scale_param, weights, *, tile_n=None):
    """PyTorch-interface path. data: (N, 2) f32. Returns (N,) f32 log-probs.

    The transpose below is the only remaining HBM plumbing; feed planar (2, N) data to
    flat_spn2d_log_prob_planar upstream to avoid it entirely.
    """
    n, two = data.shape
    assert two == 2
    data_t = data.astype(jnp.float32).T               # (2, N)
    return flat_spn2d_log_prob_planar(data_t, loc_param, scale_param, weights,
                                      tile_n=tile_n)


def _reference_log_prob(data, loc_param, scale_param, weights):
    """Pure-JAX mirror of FlatSpn2D.log_prob for verification."""
    loc = jax.nn.sigmoid(loc_param) * (MAX_LOC - MIN_LOC) + MIN_LOC
    scale = jax.nn.sigmoid(scale_param) * (MAX_SCALE - MIN_SCALE) + MIN_SCALE
    x = data[:, :, None]                                 # (N, 2, 1)
    lls = (-0.5 * ((x - loc[None]) / scale[None]) ** 2
           - jnp.log(scale)[None]
           - 0.5 * _LOG_2PI)                             # (N, 2, K)
    lls = lls.sum(axis=1)                                # (N, K)
    logw = jax.nn.log_softmax(weights)
    return jax.scipy.special.logsumexp(lls + logw[None, :], axis=1)


if __name__ == "__main__":
    # Deterministic synthetic parameters (shapes from FlatSpn2D.__init__).
    n_components = 8
    n_samples = 1000    # deliberately NOT a multiple of 128: exercises the ragged edge

    key = jax.random.PRNGKey(0)
    k_data, k_w, k_loc, k_scale = jax.random.split(key, 4)

    data = jax.random.normal(k_data, (n_samples, 2), dtype=jnp.float32)
    weights = jax.random.uniform(k_w, (n_components,), dtype=jnp.float32)
    loc_param = jax.random.normal(k_loc, (2, n_components), dtype=jnp.float32)
    scale_param = jax.random.normal(k_scale, (2, n_components), dtype=jnp.float32)

    ref = _reference_log_prob(data, loc_param, scale_param, weights)

    # 1) Small explicit tile -> multi-step grid + masked ragged tail ((N,2) interface).
    out_small = flat_spn2d_log_prob(data, loc_param, scale_param, weights, tile_n=256)
    out_small = jax.block_until_ready(out_small)
    assert out_small.shape == (n_samples,)
    assert jnp.allclose(out_small, ref, atol=1e-4, rtol=1e-5), (out_small, ref)

    # 2) Default (generation-tuned) tile, planar (2, N) zero-copy path.
    out_planar = flat_spn2d_log_prob_planar(data.T, loc_param, scale_param, weights)
    out_planar = jax.block_until_ready(out_planar)
    assert out_planar.shape == (n_samples,)
    assert jnp.allclose(out_planar, ref, atol=1e-4, rtol=1e-5), (out_planar, ref)

    print("KERNEL_OK")
</pallas_src>

<mosaic_0001>
module attributes {stable_mosaic.version = 11 : i64} {
  func.func @_log_prob_kernel(%arg0: i32, %arg1: memref<2x256xf32, #tpu.memory_space<vmem>>, %arg2: memref<8x8xf32, #tpu.memory_space<vmem>>, %arg3: memref<1x256xf32, #tpu.memory_space<vmem>>) attributes {dimension_semantics = [#tpu.dimension_semantics<parallel>], iteration_bounds = array<i64: 4>, scalar_prefetch = 0 : i64, scratch_operands = 0 : i64, tpu.core_type = #tpu.core_type<tc>, window_params = [{transform_indices = @transform_0, window_bounds = array<i64: 2, 256>}, {pipeline_mode = #tpu.pipeline_mode<synchronous>, transform_indices = @transform_1, window_bounds = array<i64: 8, 8>}, {transform_indices = @transform_2, window_bounds = array<i64: 1, 256>}]} {
    %c0 = arith.constant 0 : index
    %c0_0 = arith.constant 0 : index
    %0 = vector.load %arg1[%c0, %c0_0] : memref<2x256xf32, #tpu.memory_space<vmem>>, vector<2x256xf32>
    %c0_1 = arith.constant 0 : index
    %c0_2 = arith.constant 0 : index
    %1 = vector.load %arg2[%c0_1, %c0_2] : memref<8x8xf32, #tpu.memory_space<vmem>>, vector<8x8xf32>
    %2 = vector.extract_strided_slice %0 {offsets = [0, 0], sizes = [1, 256], strides = [1, 1]} : vector<2x256xf32> to vector<1x256xf32>
    %3 = vector.extract_strided_slice %0 {offsets = [1, 0], sizes = [1, 256], strides = [1, 1]} : vector<2x256xf32> to vector<1x256xf32>
    %4 = vector.extract_strided_slice %1 {offsets = [0, 0], sizes = [8, 1], strides = [1, 1]} : vector<8x8xf32> to vector<8x1xf32>
    %5 = vector.extract_strided_slice %1 {offsets = [0, 1], sizes = [8, 1], strides = [1, 1]} : vector<8x8xf32> to vector<8x1xf32>
    %6 = vector.extract_strided_slice %1 {offsets = [0, 2], sizes = [8, 1], strides = [1, 1]} : vector<8x8xf32> to vector<8x1xf32>
    %7 = vector.extract_strided_slice %1 {offsets = [0, 3], sizes = [8, 1], strides = [1, 1]} : vector<8x8xf32> to vector<8x1xf32>
    %8 = vector.extract_strided_slice %1 {offsets = [0, 4], sizes = [8, 1], strides = [1, 1]} : vector<8x8xf32> to vector<8x1xf32>
    %9 = vector.broadcast %2 : vector<1x256xf32> to vector<8x256xf32>
    %10 = vector.broadcast %4 : vector<8x1xf32> to vector<8x256xf32>
    %11 = arith.subf %9, %10 : vector<8x256xf32>
    %12 = vector.broadcast %3 : vector<1x256xf32> to vector<8x256xf32>
    %13 = vector.broadcast %5 : vector<8x1xf32> to vector<8x256xf32>
    %14 = arith.subf %12, %13 : vector<8x256xf32>
    %15 = arith.mulf %11, %11 : vector<8x256xf32>
    %16 = vector.broadcast %6 : vector<8x1xf32> to vector<8x256xf32>
    %17 = arith.mulf %16, %15 : vector<8x256xf32>
    %18 = vector.broadcast %8 : vector<8x1xf32> to vector<8x256xf32>
    %19 = arith.subf %18, %17 : vector<8x256xf32>
    %20 = arith.mulf %14, %14 : vector<8x256xf32>
    %21 = vector.broadcast %7 : vector<8x1xf32> to vector<8x256xf32>
    %22 = arith.mulf %21, %20 : vector<8x256xf32>
    %23 = arith.subf %19, %22 : vector<8x256xf32>
    %cst = arith.constant dense<0xFF800000> : vector<256xf32>
    %24 = vector.multi_reduction <maximumf>, %23, %cst [0] : vector<8x256xf32> to vector<256xf32>
    %25 = vector.shape_cast %24 : vector<256xf32> to vector<1x256xf32>
    %26 = vector.broadcast %25 : vector<1x256xf32> to vector<8x256xf32>
    %27 = arith.subf %23, %26 : vector<8x256xf32>
    %28 = math.exp %27 : vector<8x256xf32>
    %cst_3 = arith.constant dense<0.000000e+00> : vector<256xf32>
    %29 = vector.multi_reduction <add>, %28, %cst_3 [0] : vector<8x256xf32> to vector<256xf32>
    %30 = vector.shape_cast %29 : vector<256xf32> to vector<1x256xf32>
    %31 = math.log %30 : vector<1x256xf32>
    %32 = arith.addf %25, %31 : vector<1x256xf32>
    %c0_4 = arith.constant 0 : index
    %c0_5 = arith.constant 0 : index
    %33 = vector.load %arg3[%c0_4, %c0_5] : memref<1x256xf32, #tpu.memory_space<vmem>>, vector<1x256xf32>
    tpu.vector_store %arg3[%c0_4, %c0_5], %32 {strides = array<i32>} : memref<1x256xf32, #tpu.memory_space<vmem>>, vector<1x256xf32>,
    return
  }
  func.func @transform_0(%arg0: i32) -> (i32, i32) {
    %c0_i32 = arith.constant 0 : i32
    %c0_i32_0 = arith.constant 0 : i32
    return %c0_i32, %arg0 : i32, i32
  }
  func.func @transform_1(%arg0: i32) -> (i32, i32) {
    %c0_i32 = arith.constant 0 : i32
    %c0_i32_0 = arith.constant 0 : i32
    %c0_i32_1 = arith.constant 0 : i32
    return %c0_i32, %c0_i32_0 : i32, i32
  }
  func.func @transform_2(%arg0: i32) -> (i32, i32) {
    %c0_i32 = arith.constant 0 : i32
    %c0_i32_0 = arith.constant 0 : i32
    return %c0_i32, %arg0 : i32, i32
  }
}

</mosaic_0001>

<bundles_post_ra>
// kernel: flat_spn2d_log_prob_planar.1
= control target key start
LH: loop header
LB: loop body
LE: loop exit
PB: predicated region body
PF: predicated region fallthrough
CT: control target
= control target key end

     0   :  { %7 = vsyncpa [#allocation3], 0  ;;  %s608_s0 = inlined_call_operand.vmem [shape: f32[2,1000], index: 0, kind: input, shape index: {}]   ;;  %s609_s1 = inlined_call_operand.vmem [shape: f32[8,8], index: 1, kind: input, shape index: {}]   ;;  %s610_s2 = inlined_call_operand.hbm [shape: f32[1,1000], index: 2, kind: output, shape index: {}]  }
   0x1   :  { %9 = vsyncpa [#allocation3 + $0x1], 0  ;;  %s510_s9 = smov 0   ;;  %s512_s10 = smov 0  }
   0x2   :  { %s514_s11 = smov 0   ;;  %s516_s12 = smov 0  }
   0x3 LB: > { %s531_s13 = sadd.s32 4294967295, %s486_s12   ;;  %s354_s14 = sadd.s32 4294967294, %s486_s12   ;;  %s486_s12 = sphi %s516_s12, %s616_s12   ;;  %s482_s11 = sphi %s514_s11, %s615_s11   ;;  %s478_s10 = sphi %s512_s10, %s614_s10   ;;  %s474_s9 = sphi %s510_s9, %s613_s9  }
   0x4   : > { %s535_s15 = sadd.s32 1, %s486_s12   ;;  %s69_s16 = sadd.s32 1, %s482_s11 }
   0x5   : > { %s66_s17 = ssub.s32 %s486_s12, %s535_s15  ;;  %p79_p0 = scmp.ne.s32.totalorder %s482_s11, %s478_s10 }
   0x6   : > { %p67_p1 = scmp.eq.s32.totalorder %s66_s17, 0  ;;  %p80_p2 = scmp.eq.s32.totalorder %s531_s13, 3 }
   0x7   : > { %p85_p3 = scmp.ne.s32.totalorder %s478_s10, %s474_s9  ;;  %p86_p4 = scmp.eq.s32.totalorder %s354_s14, 3 }
   0x8   : > { %s546_s18 = scalar_select %p67_p1, %s482_s11, %s69_s16  }
   0x9   : > { %p548_p5 = por %p80_p2, %p79_p0  ;;  %p552_p6 = por %p86_p4, %p85_p3 }
   0xa   : > { %p357_p7 = scmp.ge.s32.totalorder %s486_s12, 1  ;;  %p116_p8 = scmp.lt.s32.totalorder %s486_s12, 5 }
   0xc   : > { %p117_p9 = pnand %p357_p7, %p116_p8 }
   0xd   : > { %s359_s23 = sshll.u32 (!%p117_p9), %s531_s13, 1  ;;  %s135_s28 = sand.u32 (!%p117_p9), 1, %s478_s10  }
   0xe   : > { %120 = sbr.rel (%p117_p9) target bundleno = 239 (0xef), region = 28  ;;  %p139_p10 = scmp.lt.s32.totalorder (!%p117_p9), %s359_s23, 7 }
   0xf   : > { %s358_s29 = sshll.u32 (!%p117_p9), %s135_s28, 1  ;;  %s366_s30 = sshll.u32 (!%p117_p9), %s531_s13, 5 }
  0x10   : > { %s137_s3 = scalar_lea.vmem (!%p117_p9), [#allocation2], %s358_s29  ;;  %s293_s7 = scalar_lea.hbm (!%p117_p9), %s610_s2, %s366_s30 }
  0x11   : > { %s295_s4 = sshll.u32 (!%p117_p9), %s137_s3, 4  ;;  %s281_s8 = scalar_lea.sflag (!%p117_p9), [#allocation3], %s135_s28  ;;  %s296_s4 = int_to_ptr.vmem [resolvable:$true] %s295_s4 }
  0x12   : > { %s426_s14 = scalar_lea.vmem (!%p117_p9), %s296_s4, 32  ;;  %s494_s16 = smov (!%p117_p9), [#allocation2]  }
  0x13   : > { %v146_v0 = vld [vmem:[%s609_s1] sm:$0xff]  ;;  %v488_v1 = vmov 2   ;;  %v489_v2 = vmov 0   ;;  %v490_v3 = vmov 4   ;;  %v491_v4 = vmov 1   ;;  %s618_s23 = smov (!%p139_p10, %s359_s23), 7  ;;  %p427_p11 = scmp.ne.s32.totalorder %s296_s4, %s426_s14 }
  0x14   : > { %414 = vset.pattern.permute.xlu1 %v488_v1  ;;  %412 = vset.pattern.permute.xlu0 %v489_v2  ;;  %v492_v5 = vmov 3   ;;  %v148_v6 = vlaneseq  ;;  %s360_s24 = sshll.u32 %s618_s23, 1  ;;  %s430_s13 = sshll.u32 %s494_s16, 4  ;;  %s431_s13 = int_to_ptr.vmem [resolvable:$false] %s430_s13 }
  0x15   : > { %200 = vperm.xlu1 %414, %v146_v0   ;;  %168 = vperm.xlu0 %412, %v146_v0   ;;  %s142_s27 = scalar_lea.vmem %s608_s0, %s360_s24  ;;  %p428_p12 = pnand %p427_p11, %p548_p5 }
  0x16   : > { %v563_v7 = vshrl.u32 %v148_v6, 7  ;;  %v145_v10 = vld [vmem:[%s142_s27] sm:$0xf]  ;;  %vm277_vm0 = vcmp.lt.s32.totalorder %v148_v6, 256  ;;  %s432_s17 = scalar_lea.vmem %s431_s13, 64  ;;  %p433_p0 = scmp.lt.s32.totalorder %s296_s4, %s431_s13 }
  0x17   : > { %p429_p13 = pneg %p428_p12  ;;  %p434_p1 = scmp.lt.s32.totalorder %s432_s17, %s426_s14 }
  0x18   : > { %v150_v8 = vsub.s32 0, %v563_v7  ;;  %v154_v9 = vsub.s32 2, %v563_v7  ;;  %v175_v13 = vsub.s32 1, %v563_v7  ;;  %v179_v14 = vsub.s32 3, %v563_v7 }
  0x19   : > { %415 = vset.pattern.permute.xlu1 %v490_v3  ;;  %413 = vset.pattern.permute.xlu0 %v491_v4  ;;  %p435_p2 = por %p434_p1, %p433_p0 }
  0x1a   : > { %206 = vperm.xlu1 %415, %v146_v0   ;;  %192 = vperm.xlu0 %413, %v146_v0   ;;  %v151_v11 = vrot.slane %v145_v10, %v150_v8  ;;  %v155_v12 = vrot.slane %v145_v10, %v154_v9  ;;  %v176_v17 = vrot.slane %v145_v10, %v175_v13 }
  0x1b   : > { %v180_v18 = vrot.slane %v145_v10, %v179_v14  ;;  %v493_v10 = vmov 1966171168   ;;  %p436_p3 = pnand %p435_p2, %p429_p13 }
  0x1c   : > { %v161_v15 = vrot.slane %v151_v11, %v150_v8  ;;  %v165_v16 = vrot.slane %v155_v12, %v150_v8  ;;  %v186_v23 = vrot.slane %v176_v17, %v175_v13  ;;  %v261_v11 = vunpack.c.l.s4 %v493_v10 }
  0x1d   : > { %v190_v24 = vrot.slane %v180_v18, %v175_v13 }
  0x1e   : > { %416 = vset.pattern.permute.xlu1 %v492_v5  ;;  %417 = vset.pattern.permute.xlu0 %v492_v5  ;;  %v262_v13 = vunpack.c.0.s8 %v261_v11 }
  0x1f   : > { %214 = vperm.xlu1 %416, %v146_v0  }
  0x90   : > { %v201_v19 = vpop.permute.xlu1 %200  ;;  %v169_v20 = vpop.permute.xlu0 %168 }
  0x91   : > { %v171_v21 = vsub.f32 %v161_v15, %v169_v20  ;;  %v172_v22 = vsub.f32 %v165_v16, %v169_v20 }
  0x93   : > { %v197_v25 = vmul.f32 %v171_v21, %v171_v21  ;;  %v198_v26 = vmul.f32 %v172_v22, %v172_v22 }
  0x95   : > { %v207_v27 = vpop.permute.xlu1 %206  ;;  %v193_v28 = vpop.permute.xlu0 %192  ;;  %v203_v31 = vmul.f32 %v201_v19, %v197_v25  ;;  %v204_v32 = vmul.f32 %v201_v19, %v198_v26  ;;  %v265_v19 = vsub.s32 %v262_v13, %v563_v7 }
  0x96   : > { %v195_v29 = vsub.f32 %v186_v23, %v193_v28  ;;  %v196_v30 = vsub.f32 %v190_v24, %v193_v28 }
  0x97   : > { %v209_v36 = vsub.f32 %v207_v27, %v203_v31  ;;  %v210_v37 = vsub.f32 %v207_v27, %v204_v32 }
  0x98   : > { %v211_v33 = vmul.f32 %v195_v29, %v195_v29  ;;  %v212_v34 = vmul.f32 %v196_v30, %v196_v30 }
  0x9a   : > { %v215_v35 = vpop.permute.xlu1 %214 }
  0x9b   : > { %v217_v38 = vmul.f32 %v215_v35, %v211_v33  ;;  %v218_v39 = vmul.f32 %v215_v35, %v212_v34 }
  0x9d   : > { %v219_v40 = vsub.f32 %v209_v36, %v217_v38  ;;  %v220_v41 = vsub.f32 %v210_v37, %v218_v39 }
  0x9f   : > { %v221_v42 = vrot.slane %v219_v40, 4  ;;  %v227_v43 = vrot.slane %v220_v41, 4 }
  0xa1   : > { %v222_v44 = vmax.f32 %v219_v40, %v221_v42  ;;  %v228_v45 = vmax.f32 %v220_v41, %v227_v43 }
  0xa3   : > { %v223_v46 = vrot.slane %v222_v44, 2  ;;  %v229_v47 = vrot.slane %v228_v45, 2 }
  0xa5   : > { %v224_v48 = vmax.f32 %v222_v44, %v223_v46  ;;  %v230_v49 = vmax.f32 %v228_v45, %v229_v47 }
  0xa7   : > { %v225_v50 = vrot.slane %v224_v48, 1  ;;  %v231_v51 = vrot.slane %v230_v49, 1 }
  0xa9   : > { %v226_v52 = vmax.f32 %v224_v48, %v225_v50  ;;  %v232_v53 = vmax.f32 %v230_v49, %v231_v51 }
  0xab   : > { %v233_v54 = vsub.f32 %v219_v40, %v226_v52  ;;  %v234_v55 = vsub.f32 %v220_v41, %v232_v53 }
  0xad   : > { %v235_v56 = vmul.f32 1.442695, %v233_v54  ;;  %v237_v57 = vmul.f32 1.442695, %v234_v55 }
  0xaf   : > { %418 = vpow2.f32 %v235_v56 }
  0xb0   : > { %420 = vpow2.f32 %v237_v57 }
  0xbc   : > { %v419_v58 = vpop.eup %418 }
  0xbd   : > { %v421_v59 = vpop.eup %420  ;;  %v239_v60 = vrot.slane %v419_v58, 4 }
  0xbe   : > { %v245_v61 = vrot.slane %v421_v59, 4 }
  0xbf   : > { %v240_v62 = vadd.f32 %v419_v58, %v239_v60 }
  0xc0   : > { %v246_v63 = vadd.f32 %v421_v59, %v245_v61 }
  0xc1   : > { %v241_v0 = vrot.slane %v240_v62, 2 }
  0xc2   : > { %v247_v1 = vrot.slane %v246_v63, 2 }
  0xc3   : > { %v242_v2 = vadd.f32 %v241_v0, %v240_v62 }
  0xc4   : > { %v248_v3 = vadd.f32 %v247_v1, %v246_v63 }
  0xc5   : > { %v243_v4 = vrot.slane %v242_v2, 1 }
  0xc6   : > { %v249_v5 = vrot.slane %v248_v3, 1 }
  0xc7   : > { %v244_v8 = vadd.f32 %v243_v4, %v242_v2 }
  0xc8   : > { %v250_v9 = vadd.f32 %v249_v5, %v248_v3 }
  0xc9   : > { %422 = vlog2.f32 %v244_v8 }
  0xca   : > { %424 = vlog2.f32 %v250_v9 }
  0xd6   : > { %v423_v12 = vpop.eup %422 }
  0xd7   : > { %v425_v14 = vpop.eup %424  ;;  %v252_v15 = vmul.f32 0.6931472, %v423_v12 }
  0xd8   : > { %v254_v16 = vmul.f32 0.6931472, %v425_v14 }
  0xd9   : > { %v255_v17 = vadd.f32 %v252_v15, %v226_v52 }
  0xda   : > { %v256_v18 = vadd.f32 %v254_v16, %v232_v53 }
  0xdc   : > { %v259_v20 = vcombine.low %v255_v17, %v256_v18 }
  0xde   : > { %v266_v21 = vrot.slane %v259_v20, %v265_v19 }
  0xe0   : > { %v273_v22 = vrot.slane %v266_v21, %v265_v19 }
  0xe2   : > { %279 = vst.msk [vmem:[%s137_s3] sm:$0x3] %vm277_vm0, %v273_v22 }
  0xe3   : > { %439 = shalt.err (!%p436_p3)
}
  0xe4   : > { %s440_s21 = scalar_lea.hbm %s293_s7, 32  ;;  %s444_s24 = scalar_lea.hbm %s610_s2, 128 }
  0xe5   : > { %p441_p4 = scmp.ne.s32.totalorder %s293_s7, %s440_s21  ;;  %p445_p9 = scmp.lt.s32.totalorder %s293_s7, %s610_s2 }
  0xe6   : > { %p446_p10 = scmp.lt.s32.totalorder %s444_s24, %s440_s21 }
  0xe7   : > { %p442_p7 = pnand %p441_p4, %p548_p5 }
  0xe8   : > { %p447_p11 = por %p446_p10, %p445_p9 }
  0xe9   : > { %p443_p8 = pneg %p442_p7 }
  0xeb   : > { %p448_p12 = pnand %p447_p11, %p443_p8 }
  0xed   : > { %451 = shalt.err (!%p448_p12)
}
  0xee   : > { %367 = dma.vmem_to_hbm [thread:$0]  (%p548_p5), %s296_s4, 32, %s293_s7, %s281_s8  }
  0xef PF: > { %p373_p13 = scmp.ge.s32.totalorder %s486_s12, 2  ;;  %s307_s27 = sand.u32 1, %s474_s9  }
  0xf0   : > { %s308_s28 = scalar_lea.sflag [#allocation3], %s307_s27 }
  0xf1   : > { %p370_p0 = pnand %p373_p13, %p552_p6 }
  0xf3   : > { %p371_p1 = pneg %p370_p0 }
  0xf5   : > { %469 = dma.done.wait (%p371_p1), %s308_s28, 32  }
  0xf6   : > { %471 = vsyncadd (%p371_p1), %s308_s28, 4294967264  ;;  %p12_p2 = scmp.ge.s32.totalorder %s535_s15, 6   ;;  %s613_s9 = smov %s478_s10 }
  0xf7   : > { %s614_s10 = smov %s482_s11  ;;  %s615_s11 = smov %s546_s18 }
  0xf8   : > { %s616_s12 = smov %s535_s15  ;;  %14 = sbr.rel (!%p12_p2) target bundleno = 3 (0x3), region = 63 }
  0xfd   :  { %313 = vsyncpa [#allocation3], 1 }
  0xfe   :  { %315 = vsyncpa [#allocation3 + $0x1], 1 }

</bundles_post_ra>
